<compile_context>
chip_gen: v5e
topology: v5e:2x2
jax: 0.10.0
libtpu: 0.0.40
codegen_flags: <defaults>
</compile_context>

<pallas_src>
import jax
import jax.numpy as jnp
from jax.experimental import pallas as pl
from jax.experimental.pallas import tpu as pltpu


def _sigmoid(v):
    return 1.0 / (1.0 + jnp.exp(-v))


def _gru_fc_kernel(x_ref, h_ref,
                   wir_ref, wiz_ref, win_ref,
                   whr_ref, whz_ref, whn_ref,
                   br_ref, bz_ref, bni_ref, bnh_ref,
                   wfc_ref, bfc_ref,
                   out_ref):
    # x_ref: (BT, I)   h_ref: (BT, H)   w*: (I,H)/(H,H)   biases: (1, H)
    x = x_ref[...]
    h = h_ref[...]

    def mm(a, w_ref):
        return jnp.dot(a, w_ref[...], preferred_element_type=jnp.float32)

    # PyTorch GRU gate order: r (reset), z (update), n (new).
    r = _sigmoid(mm(x, wir_ref) + mm(h, whr_ref) + br_ref[...])
    z = _sigmoid(mm(x, wiz_ref) + mm(h, whz_ref) + bz_ref[...])
    n = jnp.tanh(mm(x, win_ref) + bni_ref[...]
                 + r * (mm(h, whn_ref) + bnh_ref[...]))
    h1 = (1.0 - z) * n + z * h                       # (BT, H)

    # fc head: (BT, H) @ (H, O) + (1, O)
    out_ref[...] = mm(h1, wfc_ref) + bfc_ref[...]


def gru_model_forward(x, params, *, batch_tile=8):
    """x: (B, input_size) float32 -> (B, output_size) float32."""
    B, I = x.shape
    H = params["w_hh"].shape[1]
    O = params["fc_b"].shape[0]

    # --- host-side weight prep (per-gate split, transposed for (B,*)@(*,H)) ---
    wir, wiz, win = [jnp.transpose(w) for w in jnp.split(params["w_ih"], 3, axis=0)]
    whr, whz, whn = [jnp.transpose(w) for w in jnp.split(params["w_hh"], 3, axis=0)]
    b_ir, b_iz, b_in = jnp.split(params["b_ih"], 3)
    b_hr, b_hz, b_hn = jnp.split(params["b_hh"], 3)
    br = (b_ir + b_hr).reshape(1, H)     # reset-gate bias (input+hidden folded)
    bz = (b_iz + b_hz).reshape(1, H)     # update-gate bias (folded)
    bni = b_in.reshape(1, H)             # new-gate input bias
    bnh = b_hn.reshape(1, H)             # new-gate hidden bias (inside r*(...))
    wfc = jnp.transpose(params["fc_w"])  # (H, O)
    bfc = params["fc_b"].reshape(1, O)

    # The module always starts from a zero hidden state.
    h0 = jnp.zeros((B, H), jnp.float32)

    BT = batch_tile
    assert B % BT == 0, "batch must be a multiple of the batch tile"
    grid = (B // BT,)

    def batch_spec(cols):
        return pl.BlockSpec((BT, cols), lambda i: (i, 0))

    def full_spec(arr):
        return pl.BlockSpec(arr.shape, lambda i: (0, 0))

    # TODO(synk): num_layers > 1 (stacked GRU) not implemented; the module's
    # default num_layers=1 is what this kernel computes.
    out = pl.pallas_call(
        _gru_fc_kernel,
        out_shape=jax.ShapeDtypeStruct((B, O), jnp.float32),
        grid=grid,
        in_specs=[
            batch_spec(I), batch_spec(H),
            full_spec(wir), full_spec(wiz), full_spec(win),
            full_spec(whr), full_spec(whz), full_spec(whn),
            full_spec(br), full_spec(bz), full_spec(bni), full_spec(bnh),
            full_spec(wfc), full_spec(bfc),
        ],
        out_specs=pl.BlockSpec((BT, O), lambda i: (i, 0)),
        compiler_params=pltpu.CompilerParams(dimension_semantics=("parallel",)),
    )(x, h0, wir, wiz, win, whr, whz, whn, br, bz, bni, bnh, wfc, bfc)

    return out


def reference_forward(x, params):
    """Pure-JAX reference matching PyTorch GRUModel.forward (eval mode)."""
    B = x.shape[0]
    H = params["w_hh"].shape[1]
    h = jnp.zeros((B, H), jnp.float32)
    gi = x @ params["w_ih"].T + params["b_ih"]
    gh = h @ params["w_hh"].T + params["b_hh"]
    i_r, i_z, i_n = jnp.split(gi, 3, axis=1)
    h_r, h_z, h_n = jnp.split(gh, 3, axis=1)
    r = _sigmoid(i_r + h_r)
    z = _sigmoid(i_z + h_z)
    n = jnp.tanh(i_n + r * h_n)
    h1 = (1.0 - z) * n + z * h
    return h1 @ params["fc_w"].T + params["fc_b"]


def init_params(key, input_size, hidden_size, output_size):
    ks = jax.random.split(key, 6)
    s = 0.2
    H = hidden_size
    return {
        # PyTorch nn.GRU parameter shapes (gate order r|z|n along dim 0).
        "w_ih": s * jax.random.normal(ks[0], (3 * H, input_size), jnp.float32),
        "w_hh": s * jax.random.normal(ks[1], (3 * H, H), jnp.float32),
        "b_ih": s * jax.random.normal(ks[2], (3 * H,), jnp.float32),
        "b_hh": s * jax.random.normal(ks[3], (3 * H,), jnp.float32),
        # nn.Linear(hidden_size, output_size)
        "fc_w": s * jax.random.normal(ks[4], (output_size, H), jnp.float32),
        "fc_b": s * jax.random.normal(ks[5], (output_size,), jnp.float32),
    }


if __name__ == "__main__":
    key = jax.random.PRNGKey(0)
    k_par, k_x = jax.random.split(key)

    batch = 16          # two batch tiles of 8 -> 2-way parallel grid
    input_size = 16
    hidden_size = 32
    output_size = 8

    params = init_params(k_par, input_size, hidden_size, output_size)
    x = jax.random.normal(k_x, (batch, input_size), jnp.float32)

    y = gru_model_forward(x, params)
    y = jax.block_until_ready(y)

    y_ref = reference_forward(x, params)
    assert y.shape == (batch, output_size)
    assert jnp.allclose(y, y_ref, atol=1e-4, rtol=1e-4), "mismatch vs reference"

    print("KERNEL_OK")
</pallas_src>

<mosaic_0001>
module attributes {stable_mosaic.version = 11 : i64} {
  func.func @_gru_fc_kernel(%arg0: i32, %arg1: memref<8x16xf32, #tpu.memory_space<vmem>>, %arg2: memref<8x32xf32, #tpu.memory_space<vmem>>, %arg3: memref<16x32xf32, #tpu.memory_space<vmem>>, %arg4: memref<16x32xf32, #tpu.memory_space<vmem>>, %arg5: memref<16x32xf32, #tpu.memory_space<vmem>>, %arg6: memref<32x32xf32, #tpu.memory_space<vmem>>, %arg7: memref<32x32xf32, #tpu.memory_space<vmem>>, %arg8: memref<32x32xf32, #tpu.memory_space<vmem>>, %arg9: memref<1x32xf32, #tpu.memory_space<vmem>>, %arg10: memref<1x32xf32, #tpu.memory_space<vmem>>, %arg11: memref<1x32xf32, #tpu.memory_space<vmem>>, %arg12: memref<1x32xf32, #tpu.memory_space<vmem>>, %arg13: memref<32x8xf32, #tpu.memory_space<vmem>>, %arg14: memref<1x8xf32, #tpu.memory_space<vmem>>, %arg15: memref<8x8xf32, #tpu.memory_space<vmem>>) attributes {dimension_semantics = [#tpu.dimension_semantics<parallel>], iteration_bounds = array<i64: 2>, scalar_prefetch = 0 : i64, scratch_operands = 0 : i64, tpu.core_type = #tpu.core_type<tc>, window_params = [{transform_indices = @transform_0, window_bounds = array<i64: 8, 16>}, {transform_indices = @transform_1, window_bounds = array<i64: 8, 32>}, {pipeline_mode = #tpu.pipeline_mode<synchronous>, transform_indices = @transform_2, window_bounds = array<i64: 16, 32>}, {pipeline_mode = #tpu.pipeline_mode<synchronous>, transform_indices = @transform_3, window_bounds = array<i64: 16, 32>}, {pipeline_mode = #tpu.pipeline_mode<synchronous>, transform_indices = @transform_4, window_bounds = array<i64: 16, 32>}, {pipeline_mode = #tpu.pipeline_mode<synchronous>, transform_indices = @transform_5, window_bounds = array<i64: 32, 32>}, {pipeline_mode = #tpu.pipeline_mode<synchronous>, transform_indices = @transform_6, window_bounds = array<i64: 32, 32>}, {pipeline_mode = #tpu.pipeline_mode<synchronous>, transform_indices = @transform_7, window_bounds = array<i64: 32, 32>}, {pipeline_mode = #tpu.pipeline_mode<synchronous>, transform_indices = @transform_8, window_bounds = array<i64: 1, 32>}, {pipeline_mode = #tpu.pipeline_mode<synchronous>, transform_indices = @transform_9, window_bounds = array<i64: 1, 32>}, {pipeline_mode = #tpu.pipeline_mode<synchronous>, transform_indices = @transform_10, window_bounds = array<i64: 1, 32>}, {pipeline_mode = #tpu.pipeline_mode<synchronous>, transform_indices = @transform_11, window_bounds = array<i64: 1, 32>}, {pipeline_mode = #tpu.pipeline_mode<synchronous>, transform_indices = @transform_12, window_bounds = array<i64: 32, 8>}, {pipeline_mode = #tpu.pipeline_mode<synchronous>, transform_indices = @transform_13, window_bounds = array<i64: 1, 8>}, {transform_indices = @transform_14, window_bounds = array<i64: 8, 8>}]} {
    %c0 = arith.constant 0 : index
    %c0_0 = arith.constant 0 : index
    %0 = vector.load %arg1[%c0, %c0_0] : memref<8x16xf32, #tpu.memory_space<vmem>>, vector<8x16xf32>
    %c0_1 = arith.constant 0 : index
    %c0_2 = arith.constant 0 : index
    %1 = vector.load %arg2[%c0_1, %c0_2] : memref<8x32xf32, #tpu.memory_space<vmem>>, vector<8x32xf32>
    %c0_3 = arith.constant 0 : index
    %c0_4 = arith.constant 0 : index
    %2 = vector.load %arg3[%c0_3, %c0_4] : memref<16x32xf32, #tpu.memory_space<vmem>>, vector<16x32xf32>
    %cst = arith.constant dense<0.000000e+00> : vector<8x32xf32>
    %3 = tpu.matmul %0, %2, %cst {dimension_numbers = #tpu.dot_dimension_numbers<[1], [0], [0], [1], [0, 0, 1, 1], [], []>} : vector<8x16xf32>, vector<16x32xf32>, vector<8x32xf32> -> vector<8x32xf32>
    %c0_5 = arith.constant 0 : index
    %c0_6 = arith.constant 0 : index
    %4 = vector.load %arg6[%c0_5, %c0_6] : memref<32x32xf32, #tpu.memory_space<vmem>>, vector<32x32xf32>
    %cst_7 = arith.constant dense<0.000000e+00> : vector<8x32xf32>
    %5 = tpu.matmul %1, %4, %cst_7 {dimension_numbers = #tpu.dot_dimension_numbers<[1], [0], [0], [1], [0, 0, 1, 1], [], []>} : vector<8x32xf32>, vector<32x32xf32>, vector<8x32xf32> -> vector<8x32xf32>
    %6 = arith.addf %3, %5 : vector<8x32xf32>
    %c0_8 = arith.constant 0 : index
    %c0_9 = arith.constant 0 : index
    %7 = vector.load %arg9[%c0_8, %c0_9] : memref<1x32xf32, #tpu.memory_space<vmem>>, vector<1x32xf32>
    %8 = vector.broadcast %7 : vector<1x32xf32> to vector<8x32xf32>
    %9 = arith.addf %6, %8 : vector<8x32xf32>
    %cst_10 = arith.constant 0.000000e+00 : f32
    %10 = vector.broadcast %cst_10 : f32 to vector<8x32xf32>
    %11 = arith.subf %10, %9 : vector<8x32xf32>
    %12 = math.exp %11 : vector<8x32xf32>
    %cst_11 = arith.constant 1.000000e+00 : f32
    %13 = vector.broadcast %cst_11 : f32 to vector<8x32xf32>
    %14 = arith.addf %13, %12 : vector<8x32xf32>
    %cst_12 = arith.constant 1.000000e+00 : f32
    %15 = vector.broadcast %cst_12 : f32 to vector<8x32xf32>
    %16 = arith.divf %15, %14 : vector<8x32xf32>
    %c0_13 = arith.constant 0 : index
    %c0_14 = arith.constant 0 : index
    %17 = vector.load %arg4[%c0_13, %c0_14] : memref<16x32xf32, #tpu.memory_space<vmem>>, vector<16x32xf32>
    %cst_15 = arith.constant dense<0.000000e+00> : vector<8x32xf32>
    %18 = tpu.matmul %0, %17, %cst_15 {dimension_numbers = #tpu.dot_dimension_numbers<[1], [0], [0], [1], [0, 0, 1, 1], [], []>} : vector<8x16xf32>, vector<16x32xf32>, vector<8x32xf32> -> vector<8x32xf32>
    %c0_16 = arith.constant 0 : index
    %c0_17 = arith.constant 0 : index
    %19 = vector.load %arg7[%c0_16, %c0_17] : memref<32x32xf32, #tpu.memory_space<vmem>>, vector<32x32xf32>
    %cst_18 = arith.constant dense<0.000000e+00> : vector<8x32xf32>
    %20 = tpu.matmul %1, %19, %cst_18 {dimension_numbers = #tpu.dot_dimension_numbers<[1], [0], [0], [1], [0, 0, 1, 1], [], []>} : vector<8x32xf32>, vector<32x32xf32>, vector<8x32xf32> -> vector<8x32xf32>
    %21 = arith.addf %18, %20 : vector<8x32xf32>
    %c0_19 = arith.constant 0 : index
    %c0_20 = arith.constant 0 : index
    %22 = vector.load %arg10[%c0_19, %c0_20] : memref<1x32xf32, #tpu.memory_space<vmem>>, vector<1x32xf32>
    %23 = vector.broadcast %22 : vector<1x32xf32> to vector<8x32xf32>
    %24 = arith.addf %21, %23 : vector<8x32xf32>
    %cst_21 = arith.constant 0.000000e+00 : f32
    %25 = vector.broadcast %cst_21 : f32 to vector<8x32xf32>
    %26 = arith.subf %25, %24 : vector<8x32xf32>
    %27 = math.exp %26 : vector<8x32xf32>
    %cst_22 = arith.constant 1.000000e+00 : f32
    %28 = vector.broadcast %cst_22 : f32 to vector<8x32xf32>
    %29 = arith.addf %28, %27 : vector<8x32xf32>
    %cst_23 = arith.constant 1.000000e+00 : f32
    %30 = vector.broadcast %cst_23 : f32 to vector<8x32xf32>
    %31 = arith.divf %30, %29 : vector<8x32xf32>
    %c0_24 = arith.constant 0 : index
    %c0_25 = arith.constant 0 : index
    %32 = vector.load %arg5[%c0_24, %c0_25] : memref<16x32xf32, #tpu.memory_space<vmem>>, vector<16x32xf32>
    %cst_26 = arith.constant dense<0.000000e+00> : vector<8x32xf32>
    %33 = tpu.matmul %0, %32, %cst_26 {dimension_numbers = #tpu.dot_dimension_numbers<[1], [0], [0], [1], [0, 0, 1, 1], [], []>} : vector<8x16xf32>, vector<16x32xf32>, vector<8x32xf32> -> vector<8x32xf32>
    %c0_27 = arith.constant 0 : index
    %c0_28 = arith.constant 0 : index
    %34 = vector.load %arg11[%c0_27, %c0_28] : memref<1x32xf32, #tpu.memory_space<vmem>>, vector<1x32xf32>
    %35 = vector.broadcast %34 : vector<1x32xf32> to vector<8x32xf32>
    %36 = arith.addf %33, %35 : vector<8x32xf32>
    %c0_29 = arith.constant 0 : index
    %c0_30 = arith.constant 0 : index
    %37 = vector.load %arg8[%c0_29, %c0_30] : memref<32x32xf32, #tpu.memory_space<vmem>>, vector<32x32xf32>
    %cst_31 = arith.constant dense<0.000000e+00> : vector<8x32xf32>
    %38 = tpu.matmul %1, %37, %cst_31 {dimension_numbers = #tpu.dot_dimension_numbers<[1], [0], [0], [1], [0, 0, 1, 1], [], []>} : vector<8x32xf32>, vector<32x32xf32>, vector<8x32xf32> -> vector<8x32xf32>
    %c0_32 = arith.constant 0 : index
    %c0_33 = arith.constant 0 : index
    %39 = vector.load %arg12[%c0_32, %c0_33] : memref<1x32xf32, #tpu.memory_space<vmem>>, vector<1x32xf32>
    %40 = vector.broadcast %39 : vector<1x32xf32> to vector<8x32xf32>
    %41 = arith.addf %38, %40 : vector<8x32xf32>
    %42 = arith.mulf %16, %41 : vector<8x32xf32>
    %43 = arith.addf %36, %42 : vector<8x32xf32>
    %44 = math.tanh %43 : vector<8x32xf32>
    %cst_34 = arith.constant 1.000000e+00 : f32
    %45 = vector.broadcast %cst_34 : f32 to vector<8x32xf32>
    %46 = arith.subf %45, %31 : vector<8x32xf32>
    %47 = arith.mulf %46, %44 : vector<8x32xf32>
    %48 = arith.mulf %31, %1 : vector<8x32xf32>
    %49 = arith.addf %47, %48 : vector<8x32xf32>
    %c0_35 = arith.constant 0 : index
    %c0_36 = arith.constant 0 : index
    %50 = vector.load %arg13[%c0_35, %c0_36] : memref<32x8xf32, #tpu.memory_space<vmem>>, vector<32x8xf32>
    %cst_37 = arith.constant dense<0.000000e+00> : vector<8x8xf32>
    %51 = tpu.matmul %49, %50, %cst_37 {dimension_numbers = #tpu.dot_dimension_numbers<[1], [0], [0], [1], [0, 0, 1, 1], [], []>} : vector<8x32xf32>, vector<32x8xf32>, vector<8x8xf32> -> vector<8x8xf32>
    %c0_38 = arith.constant 0 : index
    %c0_39 = arith.constant 0 : index
    %52 = vector.load %arg14[%c0_38, %c0_39] : memref<1x8xf32, #tpu.memory_space<vmem>>, vector<1x8xf32>
    %53 = vector.broadcast %52 : vector<1x8xf32> to vector<8x8xf32>
    %54 = arith.addf %51, %53 : vector<8x8xf32>
    %c0_40 = arith.constant 0 : index
    %c0_41 = arith.constant 0 : index
    %55 = vector.load %arg15[%c0_40, %c0_41] : memref<8x8xf32, #tpu.memory_space<vmem>>, vector<8x8xf32>
    tpu.vector_store %arg15[%c0_40, %c0_41], %54 {strides = array<i32>} : memref<8x8xf32, #tpu.memory_space<vmem>>, vector<8x8xf32>,
    return
  }
  func.func @transform_0(%arg0: i32) -> (i32, i32) {
    %c0_i32 = arith.constant 0 : i32
    %c0_i32_0 = arith.constant 0 : i32
    return %arg0, %c0_i32 : i32, i32
  }
  func.func @transform_1(%arg0: i32) -> (i32, i32) {
    %c0_i32 = arith.constant 0 : i32
    %c0_i32_0 = arith.constant 0 : i32
    return %arg0, %c0_i32 : i32, i32
  }
  func.func @transform_2(%arg0: i32) -> (i32, i32) {
    %c0_i32 = arith.constant 0 : i32
    %c0_i32_0 = arith.constant 0 : i32
    %c0_i32_1 = arith.constant 0 : i32
    return %c0_i32, %c0_i32_0 : i32, i32
  }
  func.func @transform_3(%arg0: i32) -> (i32, i32) {
    %c0_i32 = arith.constant 0 : i32
    %c0_i32_0 = arith.constant 0 : i32
    %c0_i32_1 = arith.constant 0 : i32
    return %c0_i32, %c0_i32_0 : i32, i32
  }
  func.func @transform_4(%arg0: i32) -> (i32, i32) {
    %c0_i32 = arith.constant 0 : i32
    %c0_i32_0 = arith.constant 0 : i32
    %c0_i32_1 = arith.constant 0 : i32
    return %c0_i32, %c0_i32_0 : i32, i32
  }
  func.func @transform_5(%arg0: i32) -> (i32, i32) {
    %c0_i32 = arith.constant 0 : i32
    %c0_i32_0 = arith.constant 0 : i32
    %c0_i32_1 = arith.constant 0 : i32
    return %c0_i32, %c0_i32_0 : i32, i32
  }
  func.func @transform_6(%arg0: i32) -> (i32, i32) {
    %c0_i32 = arith.constant 0 : i32
    %c0_i32_0 = arith.constant 0 : i32
    %c0_i32_1 = arith.constant 0 : i32
    return %c0_i32, %c0_i32_0 : i32, i32
  }
  func.func @transform_7(%arg0: i32) -> (i32, i32) {
    %c0_i32 = arith.constant 0 : i32
    %c0_i32_0 = arith.constant 0 : i32
    %c0_i32_1 = arith.constant 0 : i32
    return %c0_i32, %c0_i32_0 : i32, i32
  }
  func.func @transform_8(%arg0: i32) -> (i32, i32) {
    %c0_i32 = arith.constant 0 : i32
    %c0_i32_0 = arith.constant 0 : i32
    %c0_i32_1 = arith.constant 0 : i32
    return %c0_i32, %c0_i32_0 : i32, i32
  }
  func.func @transform_9(%arg0: i32) -> (i32, i32) {
    %c0_i32 = arith.constant 0 : i32
    %c0_i32_0 = arith.constant 0 : i32
    %c0_i32_1 = arith.constant 0 : i32
    return %c0_i32, %c0_i32_0 : i32, i32
  }
  func.func @transform_10(%arg0: i32) -> (i32, i32) {
    %c0_i32 = arith.constant 0 : i32
    %c0_i32_0 = arith.constant 0 : i32
    %c0_i32_1 = arith.constant 0 : i32
    return %c0_i32, %c0_i32_0 : i32, i32
  }
  func.func @transform_11(%arg0: i32) -> (i32, i32) {
    %c0_i32 = arith.constant 0 : i32
    %c0_i32_0 = arith.constant 0 : i32
    %c0_i32_1 = arith.constant 0 : i32
    return %c0_i32, %c0_i32_0 : i32, i32
  }
  func.func @transform_12(%arg0: i32) -> (i32, i32) {
    %c0_i32 = arith.constant 0 : i32
    %c0_i32_0 = arith.constant 0 : i32
    %c0_i32_1 = arith.constant 0 : i32
    return %c0_i32, %c0_i32_0 : i32, i32
  }
  func.func @transform_13(%arg0: i32) -> (i32, i32) {
    %c0_i32 = arith.constant 0 : i32
    %c0_i32_0 = arith.constant 0 : i32
    %c0_i32_1 = arith.constant 0 : i32
    return %c0_i32, %c0_i32_0 : i32, i32
  }
  func.func @transform_14(%arg0: i32) -> (i32, i32) {
    %c0_i32 = arith.constant 0 : i32
    %c0_i32_0 = arith.constant 0 : i32
    return %arg0, %c0_i32 : i32, i32
  }
}

</mosaic_0001>

<bundles_post_ra>
// kernel: tpu_custom_call.1
= control target key start
LH: loop header
LB: loop body
LE: loop exit
PB: predicated region body
PF: predicated region fallthrough
CT: control target
= control target key end

     0   :  { %s1698_s0 = inlined_call_operand.hbm [shape: f32[16,16], index: 0, kind: input, shape index: {}]   ;;  %s1699_s1 = inlined_call_operand.hbm [shape: f32[16,32], index: 1, kind: input, shape index: {}]   ;;  %s1700_s2 = inlined_call_operand.hbm [shape: f32[16,32], index: 2, kind: input, shape index: {}]   ;;  %s1701_s3 = inlined_call_operand.hbm [shape: f32[16,32], index: 3, kind: input, shape index: {}]   ;;  %s1702_s4 = inlined_call_operand.hbm [shape: f32[16,32], index: 4, kind: input, shape index: {}]   ;;  %s1703_s5 = inlined_call_operand.vmem [shape: f32[32,32], index: 5, kind: input, shape index: {}]   ;;  %s1704_s6 = inlined_call_operand.hbm [shape: f32[32,32], index: 6, kind: input, shape index: {}]   ;;  %s1705_s7 = inlined_call_operand.hbm [shape: f32[32,32], index: 7, kind: input, shape index: {}]   ;;  %s1706_s8 = inlined_call_operand.vmem [shape: f32[1,32], index: 8, kind: input, shape index: {}]   ;;  %s1707_s9 = inlined_call_operand.vmem [shape: f32[1,32], index: 9, kind: input, shape index: {}]   ;;  %s1708_s10 = inlined_call_operand.vmem [shape: f32[1,32], index: 10, kind: input, shape index: {}]   ;;  %s1709_s11 = inlined_call_operand.vmem [shape: f32[1,32], index: 11, kind: input, shape index: {}]   ;;  %s1710_s12 = inlined_call_operand.vmem [shape: f32[32,8], index: 12, kind: input, shape index: {}]   ;;  %s1711_s13 = inlined_call_operand.vmem [shape: f32[1,8], index: 13, kind: input, shape index: {}]   ;;  %s1712_s14 = inlined_call_operand.vmem [shape: f32[16,8], index: 14, kind: output, shape index: {}]  }
   0x1   :  { %1713 = sst [smem:[#allocation19_spill]] %s1700_s2 }
   0x2   :  { %1714 = sst [smem:[#allocation20_spill]] %s1701_s3 }
   0x3   :  { %1715 = sst [smem:[#allocation21_spill]] %s1702_s4 }
   0x4   :  { %1716 = sst [smem:[#allocation22_spill]] %s1704_s6 }
   0x5   :  { %1717 = sst [smem:[#allocation23_spill]] %s1705_s7 }
   0x6   :  { %1718 = sst [smem:[#allocation24_spill]] %s1708_s10 }
   0x7   :  { %1719 = sst [smem:[#allocation25_spill]] %s1711_s13 }
   0x8   :  { %1720 = sst [smem:[#allocation26_spill]] %s1712_s14 }
   0x9   :  { %19 = vsyncpa [#allocation3], 0 }
   0xa   :  { %21 = vsyncpa [#allocation3 + $0x1], 0 }
   0xb   :  { %22 = vsyncpa [#allocation5], 0 }
   0xc   :  { %24 = vsyncpa [#allocation5 + $0x1], 0 }
   0xd   :  { %25 = vsyncpa [#allocation8], 0 }
   0xe   :  { %26 = vsyncpa [#allocation11], 0  ;;  %s1471_s29 = smov 0   ;;  %s1473_s30 = smov 0  }
   0xf   :  { %s1475_s15 = smov 0   ;;  %s1477_s16 = smov 0  }
  0x10 LB: > { %s1721_s2 = sld [smem:[#allocation19_spill]]  ;;  %s1495_s20 = sadd.s32 4294967295, %s1387_s16   ;;  %s1387_s16 = sphi %s1477_s16, %s1738_s16   ;;  %s1383_s15 = sphi %s1475_s15, %s1737_s15   ;;  %s1379_s30 = sphi %s1473_s30, %s1736_s30   ;;  %s1375_s29 = sphi %s1471_s29, %s1735_s29  }
  0x11   : > { %p986_p0 = scmp.ge.s32.totalorder %s1387_s16, 1  ;;  %p53_p1 = scmp.eq.s32.totalorder %s1495_s20, 0 }
  0x12   : > { %p367_p2 = scmp.lt.s32.totalorder %s1387_s16, 3  ;;  %s1389_s22 = smov [#allocation6]  }
  0x13   : > { %s380_s23 = sshll.u32 %s1389_s22, 4  ;;  %s1723_s3 = sld [smem:[#allocation20_spill]]  ;;  %s381_s23 = int_to_ptr.vmem [resolvable:$true] %s380_s23 }
  0x14   : > { %p1500_p3 = pnand %p986_p0, %p367_p2  ;;  %s1725_s6 = sld [smem:[#allocation22_spill]] }
  0x15   : > { %s1390_s22 = smov [#allocation7]   ;;  %s1391_s14 = smov 128  }
  0x16   : > { %s378_s19 = sshll.u32 %s1721_s2, 4  ;;  %p1039_p4 = pneg %p1500_p3  ;;  %s379_s19 = int_to_ptr.hbm [resolvable:$true] %s378_s19 }
  0x17   : > { %s394_s2 = sshll.u32 %s1390_s22, 4  ;;  %s1392_s13 = smov 8   ;;  %s395_s2 = int_to_ptr.vmem [resolvable:$true] %s394_s2 }
  0x18   : > { %p1511_p5 = pnand %p1039_p4, %p53_p1  ;;  %s1726_s4 = sld [smem:[#allocation21_spill]] }
  0x19   : > { %s392_s26 = sshll.u32 %s1723_s3, 4  ;;  %s1393_s10 = smov [#allocation10]   ;;  %s393_s26 = int_to_ptr.hbm [resolvable:$true] %s392_s26 }
  0x1a   : > { %s423_s18 = sshll.u32 %s1725_s6, 4  ;;  %s425_s28 = sshll.u32 %s1393_s10, 4  ;;  %s424_s18 = int_to_ptr.hbm [resolvable:$true] %s423_s18  ;;  %s426_s28 = int_to_ptr.vmem [resolvable:$true] %s425_s28 }
  0x1b   : > { %1042 = dma.hbm_to_vmem [thread:$0]  (!%p1511_p5), %s379_s19, 256, %s381_s23, [#allocation5], %s1391_s14, %s1391_s14, %s1392_s13  }
  0x1c   : > { %1045 = dma.hbm_to_vmem [thread:$0]  (!%p1511_p5), %s393_s26, 256, %s395_s2, [#allocation8], %s1391_s14, %s1391_s14, %s1392_s13  }
  0x1d   : > { %1051 = dma.hbm_to_vmem [thread:$0]  (!%p1511_p5), %s424_s18, 512, %s426_s28, [#allocation11], %s1391_s14, %s1391_s14, %s1392_s13  }
  0x1e   : > { %s406_s3 = sshll.u32 %s1726_s4, 4  ;;  %s1394_s19 = smov [#allocation9]   ;;  %s407_s3 = int_to_ptr.hbm [resolvable:$true] %s406_s3 }
  0x1f   : > { %s408_s2 = sshll.u32 %s1394_s19, 4  ;;  %s1727_s7 = sld [smem:[#allocation23_spill]]  ;;  %s409_s2 = int_to_ptr.vmem [resolvable:$true] %s408_s2 }
  0x20   : > { %1048 = dma.hbm_to_vmem [thread:$0]  (!%p1511_p5), %s407_s3, 256, %s409_s2, [#allocation8], %s1391_s14, %s1391_s14, %s1392_s13  }
  0x21   : > { %s1395_s10 = smov [#allocation12]   ;;  %s1535_s18 = sadd.s32 1, %s1387_s16  }
  0x22   : > { %s439_s22 = sshll.u32 %s1395_s10, 4  ;;  %s36_s24 = ssub.s32 %s1387_s16, %s1535_s18  ;;  %s440_s22 = int_to_ptr.vmem [resolvable:$true] %s439_s22 }
  0x23   : > { %s39_s25 = sadd.s32 1, %s1383_s15  ;;  %p37_p6 = scmp.eq.s32.totalorder %s36_s24, 0 }
  0x24   : > { %p46_p7 = scmp.ne.s32.totalorder %s1383_s15, %s1379_s30  ;;  %p47_p8 = scmp.eq.s32.totalorder %s1387_s16, 0 }
  0x25   : > { %s437_s17 = sshll.u32 %s1727_s7, 4  ;;  %p52_p9 = scmp.ne.s32.totalorder %s1379_s30, %s1375_s29  ;;  %s438_s17 = int_to_ptr.hbm [resolvable:$true] %s437_s17 }
  0x26   : > { %1054 = dma.hbm_to_vmem [thread:$0]  (!%p1511_p5), %s438_s17, 512, %s440_s22, [#allocation11], %s1391_s14, %s1391_s14, %s1392_s13  }
  0x27   : > { %s1546_s28 = scalar_select %p37_p6, %s1383_s15, %s39_s25  }
  0x28   : > { %p48_p10 = por %p47_p8, %p46_p7  ;;  %p1550_p11 = por %p53_p1, %p52_p9 }
  0x29   : > { %1728 = sst [smem:[#allocation18_spill]] %s1546_s28  ;;  %p1067_p12 = scmp.lt.s32.totalorder %s1387_s16, 2 }
  0x2a   : > { %s471_s13 = sand.u32 1, %s1383_s15   ;;  %s994_s27 = sshll.u32 %s1387_s16, 3 }
  0x2b   : > { %s1556_s14 = sshll.u32 %s471_s13, 3  ;;  %s479_s23 = scalar_lea.hbm %s1698_s0, %s994_s27 }
  0x2c   : > { %s475_s29 = scalar_lea.vmem [#allocation2], %s1556_s14  ;;  %s481_s17 = sshll.u32 %s479_s23, 4  ;;  %s482_s17 = int_to_ptr.hbm [resolvable:$true] %s481_s17 }
  0x2d   : > { %s483_s26 = sshll.u32 %s475_s29, 4  ;;  %p1563_p13 = pnand %p1067_p12, %p48_p10  ;;  %s484_s26 = int_to_ptr.vmem [resolvable:$true] %s483_s26 }
  0x2e   : > { %s498_s25 = scalar_lea.hbm %s1699_s1, %s994_s27  ;;  %s490_s4 = sand.u32 1, %s1387_s16  }
  0x2f   : > { %s472_s6 = scalar_lea.sflag [#allocation3], %s471_s13  ;;  %s1277_s7 = sshra.s32 %s482_s17, 4  ;;  %s1278_s7 = int_to_ptr.hbm [resolvable:$true] %s1277_s7 }
  0x30   : > { %s1279_s19 = scalar_lea.hbm %s1278_s7, 8  ;;  %p1281_p2 = pneg %p1563_p13 }
  0x31   : > { %p1280_p0 = scmp.ne.s32.totalorder %s1278_s7, %s1279_s19  ;;  %s1284_s29 = scalar_lea.hbm %s1698_s0, 16 }
  0x32   : > { %p1285_p6 = scmp.lt.s32.totalorder %s1278_s7, %s1698_s0  ;;  %p1286_p7 = scmp.lt.s32.totalorder %s1284_s29, %s1279_s19 }
  0x33   : > { %p1282_p4 = pnand %p1281_p2, %p1280_p0 }
  0x34   : > { %p1287_p8 = por %p1286_p7, %p1285_p6 }
  0x35   : > { %p1283_p5 = pneg %p1282_p4 }
  0x37   : > { %p1288_p9 = pnand %p1287_p8, %p1283_p5 }
  0x39   : > { %1291 = shalt.err (!%p1288_p9)
}
  0x3a   : > { %1058 = dma.hbm_to_vmem [thread:$0]  (!%p1563_p13), %s482_s17, 128, %s484_s26, %s472_s6  }
  0x3b   : > { %s500_s16 = sshll.u32 %s498_s25, 4  ;;  %s494_s13 = scalar_lea.vmem [#allocation4], %s1556_s14  ;;  %s501_s16 = int_to_ptr.hbm [resolvable:$true] %s500_s16 }
  0x3c   : > { %s502_s27 = sshll.u32 %s494_s13, 4  ;;  %s491_s2 = scalar_lea.sflag [#allocation5], %s490_s4  ;;  %s503_s27 = int_to_ptr.vmem [resolvable:$true] %s502_s27 }
  0x3d   : > { %s1307_s23 = sshra.s32 %s501_s16, 4  ;;  %s1314_s29 = scalar_lea.hbm %s1699_s1, 16  ;;  %s1308_s23 = int_to_ptr.hbm [resolvable:$true] %s1307_s23 }
  0x3e   : > { %s1309_s28 = scalar_lea.hbm %s1308_s23, 8  ;;  %p1315_p4 = scmp.lt.s32.totalorder %s1308_s23, %s1699_s1 }
  0x3f   : > { %p1310_p10 = scmp.ne.s32.totalorder %s1308_s23, %s1309_s28  ;;  %p1316_p5 = scmp.lt.s32.totalorder %s1314_s29, %s1309_s28 }
  0x41   : > { %p1312_p12 = pnand %p1310_p10, %p1281_p2  ;;  %p1317_p6 = por %p1316_p5, %p1315_p4 }
  0x43   : > { %p1313_p0 = pneg %p1312_p12 }
  0x45   : > { %p1318_p7 = pnand %p1317_p6, %p1313_p0 }
  0x47   : > { %1321 = shalt.err (!%p1318_p7)
}
  0x48   : > { %1061 = dma.hbm_to_vmem [thread:$0]  (!%p1563_p13), %s501_s16, 128, %s503_s27, %s491_s2  }
  0x49   : > { %511 = sbr.rel (%p1500_p3) target bundleno = 400 (0x190), region = 76  ;;  %s513_s4 = sand.u32 (!%p1500_p3), 1, %s1379_s30  }
  0x4a   : > { %s1599_s14 = sshll.u32 (!%p1500_p3), %s513_s4, 3  ;;  %s514_s26 = scalar_lea.sflag (!%p1500_p3), [#allocation3], %s513_s4 }
  0x4b   : > { %s517_s17 = scalar_lea.vmem (!%p1500_p3), [#allocation2], %s1599_s14 }
  0x4e   : > { %1354 = dma.done.wait (%p1550_p11), %s514_s26, 128  }
  0x4f   : > { %1356 = vsyncadd (%p1550_p11), %s514_s26, 4294967168  ;;  %s523_s28 = sand.u32 1, %s1495_s20   ;;  %s527_s21 = scalar_lea.vmem [#allocation4], %s1599_s14 }
  0x50   : > { %s524_s10 = scalar_lea.sflag [#allocation5], %s523_s28 }
  0x51   : > { %1358 = dma.done.wait (%p1550_p11), %s524_s10, 128  }
  0x52   : > { %1360 = vsyncadd (%p1550_p11), %s524_s10, 4294967168 }
  0x53   : > { %1362 = dma.done.wait (%p53_p1), [#allocation5], 256  }
  0x54   : > { %1364 = vsyncadd (%p53_p1), [#allocation5], 4294967040 }
  0x55   : > { %1366 = dma.done.wait (%p53_p1), [#allocation8], 512  }
  0x56   : > { %1368 = vsyncadd (%p53_p1), [#allocation8], 4294966784 }
  0x57   : > { %1370 = dma.done.wait (%p53_p1), [#allocation11], 1024  }
  0x58   : > { %1372 = vsyncadd (%p53_p1), [#allocation11], 4294966272  ;;  %v613_v0 = vld [vmem:[%s1703_s5 + $0x18] sm:$0xff]  ;;  %v691_v1 = vld [vmem:[#allocation10 + $0x18] sm:$0xff]  ;;  %vm638_vm0 = vcmask 130048   ;;  %vm614_vm1 = vcmask 261120  }
  0x59   : > { %v612_v2 = vld [vmem:[%s1703_s5 + $0x10] sm:$0xff]  ;;  %630 = vmatpush.msra.mxu0 %v613_v0  ;;  %704 = vmatpush.msra.mxu2 %v691_v1  ;;  %v690_v3 = vld [vmem:[#allocation10 + $0x10] sm:$0xff]  ;;  %v609_v4 = vld [vmem:[#allocation6 + $0x8] sm:$0xff]  ;;  %s1731_s13 = sld [smem:[#allocation24_spill]]  ;;  %p602_p1 = scmp.lt.s32.totalorder %s1495_s20, 1  ;;  %vm848_vm10 = vcmask 64512  }
  0x5a   : > { %v611_v5 = vld [vmem:[%s1703_s5 + $0x8] sm:$0xff]  ;;  %656 = vmatpush.msra.mxu1 %v609_v4  ;;  %v689_v6 = vld [vmem:[#allocation10 + $0x8] sm:$0xff]  ;;  %v608_v8 = vld [vmem:[#allocation6] sm:$0xff]  ;;  %s1732_s7 = sld [smem:[#allocation25_spill]] }
  0x5b   : > { %v687_v7 = vld [vmem:[#allocation7 + $0x8] sm:$0xff]  ;;  %631 = vmatpush.msra.mxu0 %v612_v2  ;;  %705 = vmatpush.msra.mxu2 %v690_v3  ;;  %v686_v9 = vld [vmem:[#allocation7] sm:$0xff]  ;;  %v610_v10 = vld [vmem:[%s1703_s5] sm:$0xff]  ;;  %s1740_s20 = smov (!%p602_p1, %s1495_s20), 1  ;;  %s1733_s22 = sld [smem:[#allocation26_spill]] }
  0x5c   : > { %726 = vmatpush.msra.mxu3 %v687_v7  ;;  %657 = vmatpush.msra.mxu1 %v608_v8  ;;  %v688_v11 = vld [vmem:[#allocation10] sm:$0xff]  ;;  %v606_v12 = vld [vmem:[%s517_s17] sm:$0xff]  ;;  %v783_v18 = vld [vmem:[#allocation12 + $0x8] sm:$0xff]  ;;  %s1005_s27 = sshll.u32 %s1740_s20, 3 }
  0x5d   : > { %632 = vmatpush.msra.mxu0 %v611_v5  ;;  %706 = vmatpush.msra.mxu2 %v689_v6  ;;  %v1640_v13 = vld [vmem:[%s527_s21] sm:$0xff]  ;;  %v785_v14 = vld [vmem:[#allocation12 + $0x18] sm:$0xff]  ;;  %v756_v16 = vld [vmem:[#allocation9] sm:$0xff] }
  0x5e   : > { %727 = vmatpush.msra.mxu3 %v686_v9  ;;  %1007 = vmatmul.msk.f32.vlgmr.msra.gmra.mxu1 %vm638_vm0, %v606_v12  ;;  %v757_v15 = vld [vmem:[#allocation9 + $0x8] sm:$0xff]  ;;  %v784_v17 = vld [vmem:[#allocation12 + $0x10] sm:$0xff]  ;;  %v782_v19 = vld [vmem:[#allocation12] sm:$0xff] }
  0x5f   : > { %633 = vmatpush.msra.mxu0 %v610_v10  ;;  %707 = vmatpush.msra.mxu2 %v688_v11  ;;  %v1112_v21 = vld [vmem:[%s1706_s8] ss:$0 sm:$0xff]  ;;  %v820_v30 = vld [vmem:[%s1710_s12 + $0x18] sm:$0xff]  ;;  %v819_v31 = vld [vmem:[%s1710_s12 + $0x10] sm:$0xff] }
  0x60   : > { %1006 = vmatmul.msk.f32.vlgmr.msra.gmra.mxu0 %vm614_vm1, %v1640_v13  ;;  %1008 = vmatmul.msk.f32.vlgmr.msra.gmra.mxu2 %vm614_vm1, %v1640_v13  ;;  %v1113_v27 = vld [vmem:[%s1707_s9] ss:$0 sm:$0xff]  ;;  %v818_v33 = vld [vmem:[%s1710_s12 + $0x8] sm:$0xff] }
  0x61   : > { %1009 = vmatmul.msk.f32.vlgmr.msra.gmra.mxu3 %vm638_vm0, %v606_v12  ;;  %776 = vmatpush.msrb.mxu1 %v757_v15  ;;  %v817_v35 = vld [vmem:[%s1710_s12] sm:$0xff]  ;;  %s605_s6 = scalar_lea.vmem %s1733_s22, %s1005_s27 }
  0x62   : > { %802 = vmatpush.msrb.mxu3 %v785_v14  ;;  %840 = vmatpush.msrb.mxu0 %v820_v30  ;;  %v1114_v45 = vld [vmem:[%s1709_s11] ss:$0 sm:$0xff] }
  0x63   : > { %777 = vmatpush.msrb.mxu1 %v756_v16  ;;  %v1115_v50 = vld [vmem:[%s1731_s13] ss:$0 sm:$0xff] }
  0x64   : > { %803 = vmatpush.msrb.mxu3 %v784_v17  ;;  %841 = vmatpush.msrb.mxu0 %v819_v31  ;;  %v1116_v11 = vld [vmem:[%s1732_s7] ss:$0 sm:$0xff] }
  0x66   : > { %804 = vmatpush.msrb.mxu3 %v783_v18  ;;  %1010 = vmatmul.msk.f32.vlgmr.msrb.gmra.mxu1 %vm638_vm0, %v606_v12 }
  0x67   : > { %842 = vmatpush.msrb.mxu0 %v818_v33 }
  0x68   : > { %805 = vmatpush.msrb.mxu3 %v782_v19 }
  0x69   : > { %1011 = vmatmul.msk.f32.vlgmr.msrb.gmra.mxu3 %vm614_vm1, %v1640_v13  ;;  %843 = vmatpush.msrb.mxu0 %v817_v35 }
  0xdb   : > { %v659_v20 = vpop.f32.mrf.mxu1 }
  0xdd   : > { %v635_v22 = vpop.f32.mrf.mxu0 }
  0xde   : > { %v660_v23 = vadd.f32 %v659_v20, %v635_v22 }
  0xe0   : > { %v666_v24 = vadd.f32 %v1112_v21, %v660_v23 }
  0xe2   : > { %v667_v25 = vsub.f32 0.0, %v666_v24 }
  0xe3   : > { %v709_v26 = vpop.f32.mrf.mxu2  ;;  %v779_v51 = vpop.f32.mrf.mxu1 }
  0xe4   : > { %v668_v28 = vmul.f32 1.442695, %v667_v25  ;;  %v729_v29 = vpop.f32.mrf.mxu3  ;;  %v780_v58 = vadd.f32 %v1115_v50, %v779_v51 }
  0xe5   : > { %v730_v32 = vadd.f32 %v729_v29, %v709_v26 }
  0xe6   : > { %1117 = vpow2.f32 %v668_v28 }
  0xe7   : > { %v736_v34 = vadd.f32 %v1113_v27, %v730_v32 }
  0xe9   : > { %v737_v36 = vsub.f32 0.0, %v736_v34 }
  0xeb   : > { %v738_v37 = vmul.f32 1.442695, %v737_v36 }
  0xec   : > { %v1118_v38 = vpop.eup %1117  ;;  %v807_v47 = vpop.f32.mrf.mxu3 }
  0xed   : > { %v670_v39 = vadd.f32 1.0, %v1118_v38  ;;  %1119 = vpow2.f32 %v738_v37  ;;  %v808_v54 = vadd.f32 %v1114_v45, %v807_v47 }
  0xef   : > { %1121 = vrcp.f32 %v670_v39  ;;  %v682_v46 = vand.u32 2147483648, %v670_v39  ;;  %v680_v49 = vand.u32 2147483647, %v670_v39  ;;  %vm676_vm3 = vweird.f32 %v670_v39 }
  0xf1   : > { %v683_v56 = vor.u32 1.1754944e-38, %v682_v46  ;;  %vm681_vm5 = vcmp.eq.f32.partialorder %v680_v49, 8.507059e+37 }
  0xf3   : > { %v1120_v40 = vpop.eup %1119 }
  0xf4   : > { %v740_v41 = vadd.f32 1.0, %v1120_v40 }
  0xf5   : > { %v1122_v42 = vpop.eup %1121 }
  0xf6   : > { %1123 = vrcp.f32 %v740_v41  ;;  %v672_v43 = vmul.f32 %v1122_v42, %v670_v39  ;;  %vm677_vm2 = vweird.f32 %v1122_v42  ;;  %v752_v62 = vand.u32 2147483648, %v740_v41 }
  0xf7   : > { %vm678_vm4 = vmor %vm676_vm3, %vm677_vm2  ;;  %v750_v0 = vand.u32 2147483647, %v740_v41  ;;  %vm746_vm7 = vweird.f32 %v740_v41 }
  0xf8   : > { %v673_v44 = vsub.f32 1.0, %v672_v43  ;;  %v753_v3 = vor.u32 1.1754944e-38, %v752_v62 }
  0xf9   : > { %vm751_vm9 = vcmp.eq.f32.partialorder %v750_v0, 8.507059e+37 }
  0xfa   : > { %v674_v48 = vmul.f32 %v1122_v42, %v673_v44 }
  0xfc   : > { %v1124_v52 = vpop.eup %1123  ;;  %v675_v53 = vadd.f32 %v1122_v42, %v674_v48 }
  0xfd   : > { %v742_v55 = vmul.f32 %v1124_v52, %v740_v41  ;;  %vm747_vm6 = vweird.f32 %v1124_v52 }
  0xfe   : > { %v679_v57 = vsel %vm678_vm4, %v1122_v42, %v675_v53  ;;  %vm748_vm8 = vmor %vm746_vm7, %vm747_vm6 }
  0xff   : > { %v743_v59 = vsub.f32 1.0, %v742_v55  ;;  %v684_v60 = vsel %vm681_vm5, %v683_v56, %v679_v57 }
 0x100   : > { %v810_v61 = vmul.f32 %v808_v54, %v684_v60 }
 0x101   : > { %v744_v63 = vmul.f32 %v1124_v52, %v743_v59 }
 0x102   : > { %v811_v1 = vadd.f32 %v810_v61, %v780_v58 }
 0x103   : > { %v745_v2 = vadd.f32 %v1124_v52, %v744_v63 }
 0x104   : > { %1125 = vtanh.f32 %v811_v1 }
 0x105   : > { %v749_v4 = vsel %vm748_vm8, %v1124_v52, %v745_v2 }
 0x106   : > { %v754_v5 = vsel %vm751_vm9, %v753_v3, %v749_v4 }
 0x107   : > { %v813_v6 = vsub.f32 1.0, %v754_v5  ;;  %v815_v9 = vmul.f32 %v754_v5, %v1640_v13 }
 0x10a   : > { %v1126_v7 = vpop.eup %1125 }
 0x10b   : > { %v814_v8 = vmul.f32 %v1126_v7, %v813_v6 }
 0x10d   : > { %v816_v10 = vadd.f32 %v815_v9, %v814_v8 }
 0x10f   : > { %1012 = vmatmul.msk.f32.vlgmr.msrb.gmra.mxu0 %vm614_vm1, %v816_v10 }
 0x18c   : > { %v845_v12 = vpop.f32.mrf.mxu0 }
 0x18d   : > { %v846_v14 = vadd.f32 %v1116_v11, %v845_v12 }
 0x18f   : > { %849 = vst.msk [vmem:[%s605_s6] sm:$0xff] %vm848_vm10, %v846_v14 }
 0x190 PF: > { %s1734_s4 = sld [smem:[#allocation18_spill]]  ;;  %p29_p3 = scmp.ge.s32.totalorder %s1535_s18, 4  }
 0x191   : > { %s1735_s29 = smov %s1379_s30  ;;  %s1736_s30 = smov %s1383_s15 }
 0x192   : > { %s1738_s16 = smov %s1535_s18  ;;  %31 = sbr.rel (!%p29_p3) target bundleno = 16 (0x10), region = 149 }
 0x196   : > { %s1737_s15 = smov %s1734_s4 }
 0x197   :  { %869 = vsyncpa [#allocation3], 1 }
 0x198   :  { %871 = vsyncpa [#allocation3 + $0x1], 1 }
 0x199   :  { %872 = vsyncpa [#allocation5], 1 }
 0x19a   :  { %874 = vsyncpa [#allocation5 + $0x1], 1 }
 0x19b   :  { %875 = vsyncpa [#allocation8], 1 }
 0x19c   :  { %876 = vsyncpa [#allocation11], 1 }

</bundles_post_ra>
